<compile_context>
chip_gen: v7x
topology: tpu7x:2x2x1
jax: 0.10.0
libtpu: 0.0.40
codegen_flags: <defaults>
</compile_context>

<pallas_src>
import functools
import math

import jax
import jax.numpy as jnp
from jax.experimental import pallas as pl
from jax.experimental.pallas import tpu as pltpu


_LANE_WIDTHS = (4096, 2048, 1024, 512, 256, 128)   # candidate lane-dense widths
_TARGET_BLOCK_BYTES = 4 * 1024 * 1024              # ~4 MiB per block (any dtype)
_VMEM_LIMIT_BYTES = 40 * 1024 * 1024               # safe scoped limit on v5e/v6e/v7x
_LN2 = math.log(2.0)


# --------------------------------------------------------------------------
# Layout helpers
# --------------------------------------------------------------------------
def _choose_layout(n, dtype, target_block_elems=None):
    """Pick a lane-dense 2D view (rows, w) covering the largest 128-aligned prefix
    of a flat length-n tensor, plus the row-block size.

    Returns (rows, w, block_rows, n_main) with n_main = rows * w <= n.
    The (n - n_main) < 128 tail (if any) is handled in plain jnp by the callers."""
    itemsize = jnp.dtype(dtype).itemsize
    sub = max(8, 32 // itemsize)                    # packed sublane multiple
    if target_block_elems is None:
        target_block_elems = max(sub * 128, _TARGET_BLOCK_BYTES // itemsize)

    w = 0
    for cand in _LANE_WIDTHS:
        if n >= cand and n % cand == 0:
            w = cand
            break
    if w == 0:
        w = 128                                     # cover the 128-aligned prefix only

    rows = n // w
    n_main = rows * w
    if rows == 0:
        return 0, w, 0, 0

    target_rows = max(1, target_block_elems // w)
    if rows <= target_rows:
        block_rows = rows                            # one full-height block
    else:
        block_rows = max(sub, (target_rows // sub) * sub)
    return rows, w, block_rows, n_main


# --------------------------------------------------------------------------
# Pallas kernels
# --------------------------------------------------------------------------
def _log_quant_kernel(scales_ref, x_ref, o_ref, *, min_val, max_val):
    """out = exp(clip(floor(log(|x|+1e-20)/delta + 0.5), min, max) * delta) * sign(x)

    Base-2 formulation so each transcendental is a single native EUP push:
    scales_ref (SMEM f32[2]) = [delta/ln2, ln2/delta]."""
    delta2 = scales_ref[0]       # = 2^-sf / ln2
    inv_delta2 = scales_ref[1]   # = ln2 * 2^sf
    x = x_ref[...].astype(jnp.float32)
    s = jnp.sign(x)
    log2_abs = jnp.log2(jnp.abs(x) + 1e-20)
    rounded = jnp.floor(log2_abs * inv_delta2 + 0.5)
    clipped = jnp.clip(rounded, min_val, max_val) * delta2
    o_ref[...] = (jnp.exp2(clipped) * s).astype(o_ref.dtype)


def _calib_max_kernel(x_ref, o_ref, *, block_rows, rows):
    """Per-block max of |log(|x| + 1e-20)|, one partial per grid step.

    The grid axis is fully 'parallel' (megacore-sharded on v7x).  Row masking
    (iota + select) only runs on the uneven last block, gated by pl.when."""
    x = x_ref[...].astype(jnp.float32)
    # +1e-20 guards exact zeros (log(0) = -inf would poison the max); intentional
    # deviation from the PyTorch reference (which uses log(|x|) with no eps).
    val = jnp.abs(jnp.log(jnp.abs(x) + 1e-20))

    if rows % block_rows != 0:
        i = pl.program_id(0)
        last = pl.num_programs(0) - 1

        @pl.when(i == last)
        def _():
            row_ids = (i * block_rows
                       + jax.lax.broadcasted_iota(jnp.int32, val.shape, 0))
            masked = jnp.where(row_ids < rows, val, 0.0)   # |log| >= 0, 0 is neutral
            o_ref[...] = jnp.broadcast_to(jnp.max(masked), o_ref.shape)

        @pl.when(i != last)
        def _():
            o_ref[...] = jnp.broadcast_to(jnp.max(val), o_ref.shape)
    else:
        o_ref[...] = jnp.broadcast_to(jnp.max(val), o_ref.shape)


# --------------------------------------------------------------------------
# Wrappers
# --------------------------------------------------------------------------
def log_linear_quantize_pallas(x, sf, bits, block_elems=None):
    """Pallas equivalent of log_linear_quantize(input, sf, bits)."""
    assert bits >= 1, bits
    if bits == 1:
        # Mirrors the PyTorch reference, which returns a tuple for bits == 1.
        return jnp.sign(x), 0.0, 0.0

    bound = 2.0 ** (bits - 1)
    min_val, max_val = -bound, bound - 1

    sf_f = jnp.asarray(sf, jnp.float32)
    # [delta/ln2, ln2/delta]:  log(|x|)/delta == log2(|x|) * (ln2 * 2^sf)
    #                          exp(k*delta)   == exp2(k * 2^-sf / ln2)
    scales = jnp.stack([jnp.exp2(-sf_f) / _LN2, _LN2 * jnp.exp2(sf_f)])

    def _tail_quant(t):
        tf = t.astype(jnp.float32)
        s = jnp.sign(tf)
        log2_abs = jnp.log2(jnp.abs(tf) + 1e-20)
        rounded = jnp.floor(log2_abs * scales[1] + 0.5)
        clipped = jnp.clip(rounded, min_val, max_val) * scales[0]
        return (jnp.exp2(clipped) * s).astype(t.dtype)

    n = x.size
    flat = x.reshape(-1)
    rows, w, block_rows, n_main = _choose_layout(n, x.dtype, block_elems)

    if n_main == 0:
        # TODO(synk): tensors with fewer than 128 elements -> plain jnp.
        return _tail_quant(flat).reshape(x.shape)

    x2d = (flat if n_main == n else flat[:n_main]).reshape(rows, w)
    kernel = functools.partial(_log_quant_kernel, min_val=min_val, max_val=max_val)
    out2d = pl.pallas_call(
        kernel,
        out_shape=jax.ShapeDtypeStruct((rows, w), x.dtype),
        grid=(pl.cdiv(rows, block_rows),),
        in_specs=[
            pl.BlockSpec(memory_space=pltpu.MemorySpace.SMEM),   # [delta/ln2, ln2/delta]
            pl.BlockSpec((block_rows, w), lambda i: (i, 0)),     # x tile
        ],
        out_specs=pl.BlockSpec((block_rows, w), lambda i: (i, 0)),
        compiler_params=pltpu.CompilerParams(
            dimension_semantics=("parallel",),
            vmem_limit_bytes=_VMEM_LIMIT_BYTES),
    )(scales, x2d)

    out_flat = out2d.reshape(-1)
    if n_main < n:
        out_flat = jnp.concatenate([out_flat, _tail_quant(flat[n_main:])])
    return out_flat.reshape(x.shape)


def _calib_abs_log_max_pallas(x, target_block_elems=None):
    """max over all elements of |log(|x| + 1e-20)| (overflow_rate == 0 case)."""
    n = x.size
    flat = x.reshape(-1)
    rows, w, block_rows, n_main = _choose_layout(n, x.dtype, target_block_elems)

    def _tail_max(t):
        return jnp.max(jnp.abs(jnp.log(jnp.abs(t.astype(jnp.float32)) + 1e-20)))

    if n_main == 0:
        return _tail_max(flat)

    x2d = (flat if n_main == n else flat[:n_main]).reshape(rows, w)
    nblocks = pl.cdiv(rows, block_rows)
    kernel = functools.partial(_calib_max_kernel, block_rows=block_rows, rows=rows)
    partial_max = pl.pallas_call(
        kernel,
        out_shape=jax.ShapeDtypeStruct((nblocks, 1, 1), jnp.float32),
        grid=(nblocks,),
        in_specs=[pl.BlockSpec((block_rows, w), lambda i: (i, 0))],
        out_specs=pl.BlockSpec((1, 1, 1), lambda i: (i, 0, 0)),
        compiler_params=pltpu.CompilerParams(
            dimension_semantics=("parallel",),
            vmem_limit_bytes=_VMEM_LIMIT_BYTES),
    )(x2d)

    result = jnp.max(partial_max)
    if n_main < n:
        result = jnp.maximum(result, _tail_max(flat[n_main:]))
    return result


def _calibration_value(x, overflow_rate):
    """v = sorted_desc(|log(|x|)|)[int(overflow_rate * N)], i.e. PyTorch's
    compute_integral_part applied to log(|x|)."""
    if overflow_rate == 0.0:
        return _calib_abs_log_max_pallas(x)
    # TODO(synk): top-k / sort selection has no clean Pallas equivalent; plain JAX.
    abs_log = jnp.abs(jnp.log(jnp.abs(x) + 1e-20)).reshape(-1)
    sorted_desc = jnp.sort(abs_log)[::-1]
    split_idx = int(overflow_rate * abs_log.shape[0])
    return sorted_desc[split_idx]


class LogQuant:
    """JAX/Pallas port of the PyTorch LogQuant module (forward semantics)."""

    def __init__(self, name, bits, sf=None, overflow_rate=0.0, counter=10):
        self.name = name
        self._counter = counter
        self.bits = bits
        self.sf = sf
        self.overflow_rate = overflow_rate

    @property
    def counter(self):
        return self._counter

    def __call__(self, x):
        if self._counter > 0:
            self._counter -= 1
            # sf_new = bits - 1 - ceil(log2(v + 1e-12)), computed on device
            # (no host sync; the quant kernel takes sf via SMEM so no recompile).
            v = _calibration_value(x, self.overflow_rate)
            sf_new = self.bits - 1 - jnp.ceil(jnp.log2(v + 1e-12))
            self.sf = sf_new if self.sf is None else jnp.minimum(
                jnp.asarray(self.sf, jnp.float32), sf_new)
            return x
        elif self._counter == -10:
            return x
        else:
            return log_linear_quantize_pallas(x, self.sf, self.bits)

    def __repr__(self):
        return "{}(sf={}, bits={}, overflow_rate={:.3f}, counter={})".format(
            self.__class__.__name__, self.sf, self.bits, self.overflow_rate,
            self.counter)


# --------------------------------------------------------------------------
# Pure-jnp reference (faithful base-e PyTorch formula) and a bucket-flip
# tolerant comparison (ULP differences between the base-2 kernel and the
# base-e reference may flip floor() at exact bucket boundaries).
# --------------------------------------------------------------------------
def _log_linear_quantize_ref(x, sf, bits):
    delta = jnp.exp2(-jnp.asarray(sf, jnp.float32))
    bound = 2.0 ** (bits - 1)
    xf = x.astype(jnp.float32)
    s = jnp.sign(xf)
    log_abs = jnp.log(jnp.abs(xf) + 1e-20)
    rounded = jnp.floor(log_abs / delta + 0.5)
    clipped = jnp.clip(rounded, -bound, bound - 1) * delta
    return (jnp.exp(clipped) * s).astype(x.dtype)


def _assert_quant_close(y, ref, sf, what):
    delta = float(jnp.exp2(-jnp.asarray(sf, jnp.float32)))
    yf = y.astype(jnp.float32)
    rf = ref.astype(jnp.float32)
    rel = jnp.abs(yf - rf) / jnp.maximum(jnp.abs(rf), 1e-30)
    mismatch_frac = float(jnp.mean((rel > 1e-4).astype(jnp.float32)))
    max_rel = float(jnp.max(rel))
    bucket_step = float(jnp.expm1(delta))        # a single-bucket flip changes |y| by this
    assert mismatch_frac <= 5e-3, (what, "too many mismatches", mismatch_frac)
    assert max_rel <= bucket_step * 1.02 + 1e-3, (what, "non-bucket mismatch", max_rel)


if __name__ == "__main__":
    # 1) small NCHW tensor: calibrate once, then quantize, check vs jnp ref.
    x = jax.random.normal(jax.random.PRNGKey(0), (2, 4, 16, 16), jnp.float32)
    q = LogQuant(name="lq", bits=8, sf=None, overflow_rate=0.0, counter=1)

    y_calib = jax.block_until_ready(q(x))          # calibration pass (Pallas max)
    assert q.sf is not None
    v_ref = jnp.max(jnp.abs(jnp.log(jnp.abs(x) + 1e-20)))
    sf_ref = q.bits - 1 - int(jnp.ceil(jnp.log2(v_ref + 1e-12)))
    assert int(q.sf) == sf_ref, (int(q.sf), sf_ref)
    assert y_calib.shape == x.shape

    y_quant = jax.block_until_ready(q(x))          # quantization pass (Pallas)
    assert y_quant.shape == x.shape
    _assert_quant_close(y_quant, _log_linear_quantize_ref(x, q.sf, q.bits), q.sf,
                        "small f32")

    # 2) awkward numel (not a multiple of 128) -> prefix kernel + jnp tail path.
    x2 = jax.random.normal(jax.random.PRNGKey(1), (3, 5, 7, 11), jnp.float32)
    y2 = jax.block_until_ready(log_linear_quantize_pallas(x2, 2, 6))
    assert y2.shape == x2.shape
    _assert_quant_close(y2, _log_linear_quantize_ref(x2, 2, 6), 2, "awkward numel")
    v2 = jax.block_until_ready(_calib_abs_log_max_pallas(x2))
    v2_ref = jnp.max(jnp.abs(jnp.log(jnp.abs(x2) + 1e-20)))
    assert jnp.allclose(v2, v2_ref, rtol=1e-5, atol=1e-6), (v2, v2_ref)

    # 3) larger tensor with a small block override: multi-block grid, uneven
    #    last block (exercises the per-block parallel calibration + masking).
    x3 = jax.random.normal(jax.random.PRNGKey(2), (2, 68, 64, 64), jnp.float32)
    v3 = jax.block_until_ready(_calib_abs_log_max_pallas(x3, target_block_elems=64 * 4096))
    v3_ref = jnp.max(jnp.abs(jnp.log(jnp.abs(x3) + 1e-20)))
    assert jnp.allclose(v3, v3_ref, rtol=1e-5, atol=1e-6), (v3, v3_ref)
    y3 = jax.block_until_ready(log_linear_quantize_pallas(x3, 3, 8, block_elems=64 * 4096))
    _assert_quant_close(y3, _log_linear_quantize_ref(x3, 3, 8), 3, "large multi-block")
    # default (big-block) path on the same tensor
    y3b = jax.block_until_ready(log_linear_quantize_pallas(x3, 3, 8))
    _assert_quant_close(y3b, _log_linear_quantize_ref(x3, 3, 8), 3, "large default-block")

    # 4) bf16 input: exercises the 16-row packed-sublane block rounding.
    x4 = jax.random.normal(jax.random.PRNGKey(3), (256, 512), jnp.bfloat16)
    y4 = jax.block_until_ready(log_linear_quantize_pallas(x4, 3, 8, block_elems=20 * 4096))
    assert y4.dtype == jnp.bfloat16 and y4.shape == x4.shape
    _assert_quant_close(y4, _log_linear_quantize_ref(x4, 3, 8), 3, "bf16")

    print("KERNEL_OK")
</pallas_src>

<mosaic_0001>
module attributes {stable_mosaic.version = 11 : i64} {
  func.func @_calib_max_kernel(%arg0: i32, %arg1: memref<1x2048xf32, #tpu.memory_space<vmem>>, %arg2: memref<1x1x1xf32, #tpu.memory_space<vmem>>) attributes {dimension_semantics = [#tpu.dimension_semantics<parallel>], iteration_bounds = array<i64: 1>, scalar_prefetch = 0 : i64, scratch_operands = 0 : i64, tpu.core_type = #tpu.core_type<tc>, window_params = [{transform_indices = @transform_0, window_bounds = array<i64: 1, 2048>}, {transform_indices = @transform_1, window_bounds = array<i64: 1, 1, 1>}]} {
    %c0 = arith.constant 0 : index
    %c0_0 = arith.constant 0 : index
    %0 = vector.load %arg1[%c0, %c0_0] : memref<1x2048xf32, #tpu.memory_space<vmem>>, vector<1x2048xf32>
    %1 = math.absf %0 : vector<1x2048xf32>
    %cst = arith.constant 9.99999968E-21 : f32
    %2 = vector.broadcast %cst : f32 to vector<1x2048xf32>
    %3 = arith.addf %1, %2 : vector<1x2048xf32>
    %4 = math.log %3 : vector<1x2048xf32>
    %5 = math.absf %4 : vector<1x2048xf32>
    %6 = vector.shape_cast %5 : vector<1x2048xf32> to vector<1x1x2048xf32>
    %cst_1 = arith.constant dense<0xFF800000> : vector<1xf32>
    %7 = vector.multi_reduction <maximumf>, %6, %cst_1 [1, 2] : vector<1x1x2048xf32> to vector<1xf32>
    %8 = vector.shape_cast %7 : vector<1xf32> to vector<1x1x1xf32>
    %9 = vector.extract %8[0, 0, 0] : f32 from vector<1x1x1xf32>
    %10 = vector.broadcast %9 : f32 to vector<1x1x1xf32>
    %c0_2 = arith.constant 0 : index
    %c0_3 = arith.constant 0 : index
    %c0_4 = arith.constant 0 : index
    %11 = vector.load %arg2[%c0_2, %c0_3, %c0_4] : memref<1x1x1xf32, #tpu.memory_space<vmem>>, vector<1x1x1xf32>
    tpu.vector_store %arg2[%c0_2, %c0_3, %c0_4], %10 {strides = array<i32>} : memref<1x1x1xf32, #tpu.memory_space<vmem>>, vector<1x1x1xf32>,
    return
  }
  func.func @transform_0(%arg0: i32) -> (i32, i32) {
    %c0_i32 = arith.constant 0 : i32
    %c0_i32_0 = arith.constant 0 : i32
    return %arg0, %c0_i32 : i32, i32
  }
  func.func @transform_1(%arg0: i32) -> (i32, i32, i32) {
    %c0_i32 = arith.constant 0 : i32
    %c0_i32_0 = arith.constant 0 : i32
    %c0_i32_1 = arith.constant 0 : i32
    return %arg0, %c0_i32, %c0_i32_0 : i32, i32, i32
  }
}

</mosaic_0001>

<bundles_post_ra>
// kernel: tpu_custom_call.1
= control target key start
LH: loop header
LB: loop body
LE: loop exit
PB: predicated region body
PF: predicated region fallthrough
CT: control target
= control target key end

     0   :  { %6 = vsyncpa [#allocation3], 0  ;;  %s282_s0 = inlined_call_operand.hbm [shape: f32[1,2048], index: 0, kind: input, shape index: {}]   ;;  %s283_s1 = inlined_call_operand.hbm [shape: f32[1,1,1], index: 1, kind: output, shape index: {}]  }
   0x1   :  { %7 = vsyncpa [#allocation4], 0  ;;  %s230_s6 = smov [#allocation2]   ;;  %s182_s10 = scalar_lea.hbm %s282_s0, 256 }
   0x2   :  { %s14_s7 = sshll.u32 %s230_s6, 4  ;;  %p183_p0 = scmp.ne.s32.totalorder %s282_s0, %s182_s10  ;;  %s15_s7 = int_to_ptr.vmem [resolvable:$true] %s14_s7 }
   0x3   :  { %p186_p1 = scmp.lt.u32.totalorder %s182_s10, %s282_s0 }
   0x5   :  { %p188_p2 = pnand %p186_p1, %p183_p0 }
   0x7   :  { %191 = shalt.err (!%p188_p2)
}
   0x8   :  { %s192_s15 = scalar_lea.vmem %s15_s7, 256  ;;  %p197_p4 = scmp.lt.s32.totalorder %s15_s7, %s15_s7 }
   0x9   :  { %p193_p3 = scmp.ne.s32.totalorder %s15_s7, %s192_s15  ;;  %p198_p5 = scmp.lt.s32.totalorder %s192_s15, %s192_s15 }
   0xb   :  { %p199_p6 = por %p198_p5, %p197_p4 }
   0xd   :  { %p200_p7 = pnand %p199_p6, %p193_p3 }
   0xf   :  { %203 = shalt.err (!%p200_p7)
}
  0x10   :  { %17 = dma.hbm_to_vmem [thread:$0]  %s282_s0, 256, %s15_s7, [#allocation3]  }
  0x11   :  { %226 = dma.done.wait [#allocation3], 256  }
  0x12   :  { %227 = vsyncadd [#allocation3], 4294967040  ;;  %v21_v0 = vld [vmem:[#allocation2] sm:$0xff]  ;;  %v22_v1 = vld [vmem:[#allocation2 + $0x8] sm:$0xff]  ;;  %v35_v6 = vlaneseq  ;;  %vm115_vm0 = vcmask 1040384   ;;  %s231_s0 = smov [#allocation5]  }
  0x13   :  { %v23_v2 = vand.u32 2147483647, %v21_v0  ;;  %v24_v3 = vand.u32 2147483647, %v22_v1  ;;  %s165_s18 = sshll.u32 %s231_s0, 4  ;;  %vm157_vm1 = vcmask 0   ;;  %s166_s18 = int_to_ptr.vmem [resolvable:$true] %s165_s18 }
  0x14   :  { %v36_v7 = vshrl.u32 %v35_v6, 7  ;;  %s204_s20 = scalar_lea.vmem %s166_s18, 16  ;;  %s208_s21 = scalar_lea.vmem %s166_s18, 32 }
  0x15   :  { %v25_v4 = vadd.f32 1e-20, %v23_v2  ;;  %v26_v5 = vadd.f32 1e-20, %v24_v3  ;;  %p205_p8 = scmp.ne.s32.totalorder %s166_s18, %s204_s20  ;;  %p209_p9 = scmp.lt.s32.totalorder %s166_s18, %s166_s18 }
  0x16   :  { %v37_v9 = vsub.s32 0, %v36_v7  ;;  %v41_v10 = vsub.s32 1, %v36_v7  ;;  %v45_v13 = vsub.s32 2, %v36_v7  ;;  %v49_v14 = vsub.s32 3, %v36_v7  ;;  %p210_p10 = scmp.lt.s32.totalorder %s208_s21, %s204_s20 }
  0x17   :  { %178 = vlog2.f32 %v25_v4  ;;  %v53_v15 = vsub.s32 4, %v36_v7  ;;  %v57_v17 = vsub.s32 5, %v36_v7  ;;  %v61_v18 = vsub.s32 6, %v36_v7 }
  0x18   :  { %180 = vlog2.f32 %v26_v5  ;;  %v65_v19 = vsub.s32 7, %v36_v7  ;;  %p211_p11 = por %p210_p10, %p209_p9 }
  0x1a   :  { %p212_p12 = pnand %p211_p11, %p205_p8 }
  0x21   :  { %v179_v8 = vpop.eup %178 }
  0x22   :  { %v181_v11 = vpop.eup %180  ;;  %v28_v12 = vmul.f32 0.6931472, %v179_v8 }
  0x23   :  { %v30_v16 = vmul.f32 0.6931472, %v181_v11 }
  0x24   :  { %v31_v20 = vand.u32 2147483647, %v28_v12 }
  0x25   :  { %v32_v21 = vand.u32 2147483647, %v30_v16 }
  0x26   :  { %v38_v22 = vrot.slane %v31_v20, %v37_v9  ;;  %v42_v23 = vrot.slane %v31_v20, %v41_v10  ;;  %v46_v24 = vrot.slane %v31_v20, %v45_v13  ;;  %v50_v25 = vrot.slane %v31_v20, %v49_v14 }
  0x27   :  { %v54_v26 = vrot.slane %v31_v20, %v53_v15  ;;  %v58_v27 = vrot.slane %v31_v20, %v57_v17  ;;  %v62_v28 = vrot.slane %v31_v20, %v61_v18  ;;  %v66_v29 = vrot.slane %v31_v20, %v65_v19 }
  0x28   :  { %v70_v30 = vrot.slane %v32_v21, %v37_v9  ;;  %v74_v31 = vrot.slane %v32_v21, %v41_v10  ;;  %v78_v32 = vrot.slane %v32_v21, %v45_v13  ;;  %v82_v33 = vrot.slane %v32_v21, %v49_v14 }
  0x29   :  { %v86_v34 = vrot.slane %v32_v21, %v53_v15  ;;  %v90_v35 = vrot.slane %v32_v21, %v57_v17  ;;  %v94_v36 = vrot.slane %v32_v21, %v61_v18  ;;  %v98_v37 = vrot.slane %v32_v21, %v65_v19 }
  0x2a   :  { %v116_v38 = vsel %vm115_vm0, %v38_v22, -inf  ;;  %v117_v39 = vsel %vm115_vm0, %v42_v23, -inf  ;;  %v118_v40 = vsel %vm115_vm0, %v46_v24, -inf  ;;  %v119_v41 = vsel %vm115_vm0, %v50_v25, -inf }
  0x2b   :  { %v120_v42 = vsel %vm115_vm0, %v54_v26, -inf  ;;  %v122_v43 = vsel %vm115_vm0, %v58_v27, -inf  ;;  %v124_v44 = vsel %vm115_vm0, %v62_v28, -inf  ;;  %v126_v45 = vsel %vm115_vm0, %v66_v29, -inf }
  0x2c   :  { %v121_v46 = vmax.f32 %v116_v38, %v120_v42  ;;  %v123_v47 = vmax.f32 %v117_v39, %v122_v43  ;;  %v125_v48 = vmax.f32 %v118_v40, %v124_v44  ;;  %v127_v49 = vmax.f32 %v119_v41, %v126_v45 }
  0x2d   :  { %v128_v50 = vsel %vm115_vm0, %v70_v30, -inf  ;;  %v130_v51 = vsel %vm115_vm0, %v74_v31, -inf  ;;  %v132_v52 = vsel %vm115_vm0, %v78_v32, -inf  ;;  %v134_v53 = vsel %vm115_vm0, %v82_v33, -inf }
  0x2e   :  { %v129_v54 = vmax.f32 %v121_v46, %v128_v50  ;;  %v131_v55 = vmax.f32 %v123_v47, %v130_v51  ;;  %v133_v56 = vmax.f32 %v125_v48, %v132_v52  ;;  %v135_v57 = vmax.f32 %v127_v49, %v134_v53 }
  0x2f   :  { %v136_v58 = vsel %vm115_vm0, %v86_v34, -inf  ;;  %v138_v59 = vsel %vm115_vm0, %v90_v35, -inf  ;;  %v140_v60 = vsel %vm115_vm0, %v94_v36, -inf  ;;  %v142_v61 = vsel %vm115_vm0, %v98_v37, -inf }
  0x30   :  { %v137_v62 = vmax.f32 %v129_v54, %v136_v58  ;;  %v139_v63 = vmax.f32 %v131_v55, %v138_v59  ;;  %v141_v0 = vmax.f32 %v133_v56, %v140_v60  ;;  %v143_v1 = vmax.f32 %v135_v57, %v142_v61 }
  0x32   :  { %v144_v2 = vmax.f32 %v137_v62, %v139_v63  ;;  %v145_v3 = vmax.f32 %v141_v0, %v143_v1 }
  0x34   :  { %v146_v4 = vmax.f32 %v144_v2, %v145_v3 }
  0x36   :  { %147 = vmax.xlane.f32.xlu0 %v146_v4 }
  0xc3   :  { %v148_v5 = vpop.xlane.xlu0 %147 }
  0xc4   :  { %v149_v6 = vrot.slane %v148_v5, 4 }
  0xc6   :  { %v150_v7 = vmax.f32 %v148_v5, %v149_v6 }
  0xc8   :  { %v151_v8 = vrot.slane %v150_v7, 2 }
  0xca   :  { %v152_v9 = vmax.f32 %v150_v7, %v151_v8 }
  0xcc   :  { %v153_v10 = vrot.slane %v152_v9, 1 }
  0xce   :  { %v154_v11 = vmax.f32 %v152_v9, %v153_v10 }
  0xd0   :  { %174 = vpush %v154_v11 }
 0x101   :  { %s175_s19 = spop %174 }
 0x102   :  { %v156_v12 = vstv %s175_s19 }
 0x103   :  { %158 = vst.msk [vmem:[#allocation5] sm:$0x1] %vm157_vm1, %v156_v12 }
 0x104   :  { %215 = shalt.err (!%p212_p12)
}
 0x105   :  { %s216_s24 = scalar_lea.hbm %s283_s1, 16 }
 0x106   :  { %p217_p13 = scmp.ne.s32.totalorder %s283_s1, %s216_s24  ;;  %p220_p0 = scmp.lt.u32.totalorder %s216_s24, %s283_s1 }
 0x108   :  { %p222_p1 = pnand %p220_p0, %p217_p13 }
 0x10a   :  { %225 = shalt.err (!%p222_p1)
}
 0x10b   :  { %168 = dma.vmem_to_hbm [thread:$0]  %s166_s18, 16, %s283_s1, [#allocation4]  }
 0x10c   :  { %228 = dma.done.wait [#allocation4], 16  }
 0x10d   :  { %229 = vsyncadd [#allocation4], 4294967280 }
 0x10e   :  { %172 = vsyncpa [#allocation3], 1 }
 0x10f   :  { %173 = vsyncpa [#allocation4], 1 }

</bundles_post_ra>
